<compile_context>
chip_gen: v6e
topology: v6e:2x2x1
jax: 0.10.0
libtpu: 0.0.40
codegen_flags: <defaults>
</compile_context>

<pallas_src>
import jax
import jax.numpy as jnp
from jax.experimental import pallas as pl
from jax.experimental.pallas import tpu as pltpu


def encoder_kernel(xt_ref, w1_ref, b1_ref, w2_ref, b2_ref, w3_ref, b3_ref, ot_ref):
    # Layer 1: Linear(x_dim, N) + Dropout(eval = identity) + ReLU
    xt = xt_ref[...]                                              # [x_dim, blk]
    h1 = jnp.dot(w1_ref[...], xt, preferred_element_type=jnp.float32)
    h1 = jnp.maximum(h1 + b1_ref[...], 0.0)                       # [N, blk]

    # Layer 2: Linear(N, N) + Dropout(eval = identity) + ReLU
    h2 = jnp.dot(w2_ref[...], h1, preferred_element_type=jnp.float32)
    h2 = jnp.maximum(h2 + b2_ref[...], 0.0)                       # [N, blk]

    # Layer 3: Linear(N, z_dim)
    ot = jnp.dot(w3_ref[...], h2, preferred_element_type=jnp.float32) + b3_ref[...]
    ot_ref[...] = ot.astype(ot_ref.dtype)                         # [z_dim, blk]


def _pick_block_b(batch):
    """Lane-aligned batch tile (batch is the 128-lane axis of every tile)."""
    if batch <= 256:
        return batch                        # single full block (full-dim => legal)
    blk = min(8192, batch)                  # weights resident -> big tiles ~free
    blk -= blk % 128                        # lane-dense, unmasked vld/vst
    if pl.cdiv(batch, blk) < 2:             # keep >=2 steps so the 'parallel'
        blk = max(128, ((batch // 2) // 128) * 128)   # axis shards over 2 TCs (v7x)
    return blk


def _vmem_limit_bytes(block_b, x_dim, N, z_dim):
    # Double-buffered x^T / out^T tiles, double-buffered weights+biases,
    # two f32 intermediates, then 2x headroom for Mosaic scratch.
    per_step = (2 * x_dim * block_b * 4
                + 2 * z_dim * block_b * 4
                + 2 * N * block_b * 4
                + 2 * (N * x_dim + N * N + z_dim * N + 2 * N + z_dim) * 4)
    # Floor 16 MiB; cap 48 MiB (leaves headroom on v7x's 64 MiB per-TC VMEM,
    # comfortably inside v5e/v6e's 128 MiB).
    return int(min(max(2 * per_step, 16 * 1024 * 1024), 48 * 1024 * 1024))


def encoder_forward(x, params, *, block_b=None):
    """Fused MLP encoder. x: [B, x_dim] float32 -> [B, z_dim] float32."""
    w1, b1, w2, b2, w3, b3 = params          # w*: (out, in), b*: (out, 1)
    B, x_dim = x.shape
    N = w1.shape[0]
    z_dim = w3.shape[0]

    if block_b is None:
        block_b = _pick_block_b(B)
    grid = (pl.cdiv(B, block_b),)

    cost = pl.CostEstimate(
        flops=2 * B * (x_dim * N + N * N + N * z_dim),
        transcendentals=0,
        bytes_accessed=(B * (x_dim + z_dim) * 4
                        + (x_dim * N + N * N + N * z_dim + 2 * N + z_dim) * 4),
    )

    # Wrapper-side layout plumbing: batch onto the lane axis.
    xt = x.T                                  # [x_dim, B]

    out_t = pl.pallas_call(
        encoder_kernel,
        out_shape=jax.ShapeDtypeStruct((z_dim, B), jnp.float32),
        grid_spec=pltpu.PrefetchScalarGridSpec(
            num_scalar_prefetch=0,
            grid=grid,
            in_specs=[
                pl.BlockSpec((x_dim, block_b), lambda i: (0, i)),  # x^T tile
                pl.BlockSpec((N, x_dim), lambda i: (0, 0)),        # W1 (resident)
                pl.BlockSpec((N, 1), lambda i: (0, 0)),            # b1
                pl.BlockSpec((N, N), lambda i: (0, 0)),            # W2
                pl.BlockSpec((N, 1), lambda i: (0, 0)),            # b2
                pl.BlockSpec((z_dim, N), lambda i: (0, 0)),        # W3
                pl.BlockSpec((z_dim, 1), lambda i: (0, 0)),        # b3
            ],
            out_specs=pl.BlockSpec((z_dim, block_b), lambda i: (0, i)),
        ),
        compiler_params=pltpu.CompilerParams(
            dimension_semantics=("parallel",),
            vmem_limit_bytes=_vmem_limit_bytes(block_b, x_dim, N, z_dim),
        ),
        cost_estimate=cost,
    )(xt, w1, b1, w2, b2, w3, b3)

    return out_t.T                            # [B, z_dim]


def init_params(key, x_dim, N, z_dim):
    """Deterministic init mimicking nn.Linear's U(-1/sqrt(fan_in), +1/sqrt(fan_in)).

    Weights are (out_features, in_features) — nn.Linear's native layout —
    and biases are (out_features, 1) column vectors.
    """
    ks = jax.random.split(key, 6)

    def lin(kw, kb, fan_in, fan_out):
        bound = 1.0 / jnp.sqrt(fan_in)
        w = jax.random.uniform(kw, (fan_out, fan_in), jnp.float32, -bound, bound)
        b = jax.random.uniform(kb, (fan_out, 1), jnp.float32, -bound, bound)
        return w, b

    w1, b1 = lin(ks[0], ks[1], x_dim, N)
    w2, b2 = lin(ks[2], ks[3], N, N)
    w3, b3 = lin(ks[4], ks[5], N, z_dim)
    return (w1, b1, w2, b2, w3, b3)


def _reference(x, params):
    """Eval-mode f32 reference (dropout = identity)."""
    w1, b1, w2, b2, w3, b3 = params
    hp = jax.lax.Precision.HIGHEST
    h = jnp.maximum(jnp.dot(x, w1.T, precision=hp) + b1.T, 0.0)
    h = jnp.maximum(jnp.dot(h, w2.T, precision=hp) + b2.T, 0.0)
    return jnp.dot(h, w3.T, precision=hp) + b3.T


if __name__ == "__main__":
    key = jax.random.PRNGKey(0)
    k_x, k_x2, k_p = jax.random.split(key, 3)

    # Encoder(x_dim=32, N=64, z_dim=16)
    x_dim, N, z_dim = 32, 64, 16
    params = init_params(k_p, x_dim, N, z_dim)

    # Case 1: small batch, single full block.
    B1 = 64
    x1 = jax.random.normal(k_x, (B1, x_dim), dtype=jnp.float32)
    out1 = encoder_forward(x1, params)
    jax.block_until_ready(out1)
    assert out1.shape == (B1, z_dim)
    ref1 = _reference(x1, params)
    assert jnp.allclose(out1, ref1, atol=2e-2, rtol=2e-2), \
        float(jnp.max(jnp.abs(out1 - ref1)))

    # Case 2: ragged batch (not a multiple of the 128-lane tile) -> 2 grid
    # steps with a padded last block; valid rows must still be exact.
    B2 = 300
    x2 = jax.random.normal(k_x2, (B2, x_dim), dtype=jnp.float32)
    out2 = encoder_forward(x2, params)
    jax.block_until_ready(out2)
    assert out2.shape == (B2, z_dim)
    ref2 = _reference(x2, params)
    assert jnp.allclose(out2, ref2, atol=2e-2, rtol=2e-2), \
        float(jnp.max(jnp.abs(out2 - ref2)))

    print("KERNEL_OK")
</pallas_src>

<mosaic_0001>
module attributes {stable_mosaic.version = 11 : i64} {
  func.func @encoder_kernel(%arg0: i32, %arg1: memref<32x64xf32, #tpu.memory_space<vmem>>, %arg2: memref<64x32xf32, #tpu.memory_space<vmem>>, %arg3: memref<64x1xf32, #tpu.memory_space<vmem>>, %arg4: memref<64x64xf32, #tpu.memory_space<vmem>>, %arg5: memref<64x1xf32, #tpu.memory_space<vmem>>, %arg6: memref<16x64xf32, #tpu.memory_space<vmem>>, %arg7: memref<16x1xf32, #tpu.memory_space<vmem>>, %arg8: memref<16x64xf32, #tpu.memory_space<vmem>>) attributes {dimension_semantics = [#tpu.dimension_semantics<parallel>], iteration_bounds = array<i64: 1>, scalar_prefetch = 0 : i64, scratch_operands = 0 : i64, tpu.core_type = #tpu.core_type<tc>, window_params = [{transform_indices = @transform_0, window_bounds = array<i64: 32, 64>}, {pipeline_mode = #tpu.pipeline_mode<synchronous>, transform_indices = @transform_1, window_bounds = array<i64: 64, 32>}, {pipeline_mode = #tpu.pipeline_mode<synchronous>, transform_indices = @transform_2, window_bounds = array<i64: 64, 1>}, {pipeline_mode = #tpu.pipeline_mode<synchronous>, transform_indices = @transform_3, window_bounds = array<i64: 64, 64>}, {pipeline_mode = #tpu.pipeline_mode<synchronous>, transform_indices = @transform_4, window_bounds = array<i64: 64, 1>}, {pipeline_mode = #tpu.pipeline_mode<synchronous>, transform_indices = @transform_5, window_bounds = array<i64: 16, 64>}, {pipeline_mode = #tpu.pipeline_mode<synchronous>, transform_indices = @transform_6, window_bounds = array<i64: 16, 1>}, {transform_indices = @transform_7, window_bounds = array<i64: 16, 64>}]} {
    %c0 = arith.constant 0 : index
    %c0_0 = arith.constant 0 : index
    %0 = vector.load %arg1[%c0, %c0_0] : memref<32x64xf32, #tpu.memory_space<vmem>>, vector<32x64xf32>
    %c0_1 = arith.constant 0 : index
    %c0_2 = arith.constant 0 : index
    %1 = vector.load %arg2[%c0_1, %c0_2] : memref<64x32xf32, #tpu.memory_space<vmem>>, vector<64x32xf32>
    %cst = arith.constant dense<0.000000e+00> : vector<64x64xf32>
    %2 = tpu.matmul %1, %0, %cst {dimension_numbers = #tpu.dot_dimension_numbers<[1], [0], [0], [1], [0, 0, 1, 1], [], []>} : vector<64x32xf32>, vector<32x64xf32>, vector<64x64xf32> -> vector<64x64xf32>
    %c0_3 = arith.constant 0 : index
    %c0_4 = arith.constant 0 : index
    %3 = vector.load %arg3[%c0_3, %c0_4] : memref<64x1xf32, #tpu.memory_space<vmem>>, vector<64x1xf32>
    %4 = vector.broadcast %3 : vector<64x1xf32> to vector<64x64xf32>
    %5 = arith.addf %2, %4 : vector<64x64xf32>
    %cst_5 = arith.constant 0.000000e+00 : f32
    %6 = vector.broadcast %cst_5 : f32 to vector<64x64xf32>
    %7 = arith.maximumf %5, %6 : vector<64x64xf32>
    %c0_6 = arith.constant 0 : index
    %c0_7 = arith.constant 0 : index
    %8 = vector.load %arg4[%c0_6, %c0_7] : memref<64x64xf32, #tpu.memory_space<vmem>>, vector<64x64xf32>
    %cst_8 = arith.constant dense<0.000000e+00> : vector<64x64xf32>
    %9 = tpu.matmul %8, %7, %cst_8 {dimension_numbers = #tpu.dot_dimension_numbers<[1], [0], [0], [1], [0, 0, 1, 1], [], []>} : vector<64x64xf32>, vector<64x64xf32>, vector<64x64xf32> -> vector<64x64xf32>
    %c0_9 = arith.constant 0 : index
    %c0_10 = arith.constant 0 : index
    %10 = vector.load %arg5[%c0_9, %c0_10] : memref<64x1xf32, #tpu.memory_space<vmem>>, vector<64x1xf32>
    %11 = vector.broadcast %10 : vector<64x1xf32> to vector<64x64xf32>
    %12 = arith.addf %9, %11 : vector<64x64xf32>
    %cst_11 = arith.constant 0.000000e+00 : f32
    %13 = vector.broadcast %cst_11 : f32 to vector<64x64xf32>
    %14 = arith.maximumf %12, %13 : vector<64x64xf32>
    %c0_12 = arith.constant 0 : index
    %c0_13 = arith.constant 0 : index
    %15 = vector.load %arg6[%c0_12, %c0_13] : memref<16x64xf32, #tpu.memory_space<vmem>>, vector<16x64xf32>
    %cst_14 = arith.constant dense<0.000000e+00> : vector<16x64xf32>
    %16 = tpu.matmul %15, %14, %cst_14 {dimension_numbers = #tpu.dot_dimension_numbers<[1], [0], [0], [1], [0, 0, 1, 1], [], []>} : vector<16x64xf32>, vector<64x64xf32>, vector<16x64xf32> -> vector<16x64xf32>
    %c0_15 = arith.constant 0 : index
    %c0_16 = arith.constant 0 : index
    %17 = vector.load %arg7[%c0_15, %c0_16] : memref<16x1xf32, #tpu.memory_space<vmem>>, vector<16x1xf32>
    %18 = vector.broadcast %17 : vector<16x1xf32> to vector<16x64xf32>
    %19 = arith.addf %16, %18 : vector<16x64xf32>
    %c0_17 = arith.constant 0 : index
    %c0_18 = arith.constant 0 : index
    %20 = vector.load %arg8[%c0_17, %c0_18] : memref<16x64xf32, #tpu.memory_space<vmem>>, vector<16x64xf32>
    tpu.vector_store %arg8[%c0_17, %c0_18], %19 {strides = array<i32>} : memref<16x64xf32, #tpu.memory_space<vmem>>, vector<16x64xf32>,
    return
  }
  func.func @transform_0(%arg0: i32) -> (i32, i32) {
    %c0_i32 = arith.constant 0 : i32
    %c0_i32_0 = arith.constant 0 : i32
    return %c0_i32, %arg0 : i32, i32
  }
  func.func @transform_1(%arg0: i32) -> (i32, i32) {
    %c0_i32 = arith.constant 0 : i32
    %c0_i32_0 = arith.constant 0 : i32
    %c0_i32_1 = arith.constant 0 : i32
    return %c0_i32, %c0_i32_0 : i32, i32
  }
  func.func @transform_2(%arg0: i32) -> (i32, i32) {
    %c0_i32 = arith.constant 0 : i32
    %c0_i32_0 = arith.constant 0 : i32
    %c0_i32_1 = arith.constant 0 : i32
    return %c0_i32, %c0_i32_0 : i32, i32
  }
  func.func @transform_3(%arg0: i32) -> (i32, i32) {
    %c0_i32 = arith.constant 0 : i32
    %c0_i32_0 = arith.constant 0 : i32
    %c0_i32_1 = arith.constant 0 : i32
    return %c0_i32, %c0_i32_0 : i32, i32
  }
  func.func @transform_4(%arg0: i32) -> (i32, i32) {
    %c0_i32 = arith.constant 0 : i32
    %c0_i32_0 = arith.constant 0 : i32
    %c0_i32_1 = arith.constant 0 : i32
    return %c0_i32, %c0_i32_0 : i32, i32
  }
  func.func @transform_5(%arg0: i32) -> (i32, i32) {
    %c0_i32 = arith.constant 0 : i32
    %c0_i32_0 = arith.constant 0 : i32
    %c0_i32_1 = arith.constant 0 : i32
    return %c0_i32, %c0_i32_0 : i32, i32
  }
  func.func @transform_6(%arg0: i32) -> (i32, i32) {
    %c0_i32 = arith.constant 0 : i32
    %c0_i32_0 = arith.constant 0 : i32
    %c0_i32_1 = arith.constant 0 : i32
    return %c0_i32, %c0_i32_0 : i32, i32
  }
  func.func @transform_7(%arg0: i32) -> (i32, i32) {
    %c0_i32 = arith.constant 0 : i32
    %c0_i32_0 = arith.constant 0 : i32
    return %c0_i32, %arg0 : i32, i32
  }
}

</mosaic_0001>

<bundles_post_ra>
// kernel: tpu_custom_call.1
= control target key start
LH: loop header
LB: loop body
LE: loop exit
PB: predicated region body
PF: predicated region fallthrough
CT: control target
= control target key end

     0   :  { %vm87_vm0 = vcmask 261120   ;;  %v683_v3 = vmov 0   ;;  %s870_s0 = inlined_call_operand.vmem [shape: f32[32,64], index: 0, kind: input, shape index: {}]   ;;  %s871_s1 = inlined_call_operand.vmem [shape: f32[64,32], index: 1, kind: input, shape index: {}]   ;;  %s872_s2 = inlined_call_operand.vmem [shape: f32[64,1], index: 2, kind: input, shape index: {}]   ;;  %s873_s3 = inlined_call_operand.vmem [shape: f32[64,64], index: 3, kind: input, shape index: {}]   ;;  %s874_s4 = inlined_call_operand.vmem [shape: f32[64,1], index: 4, kind: input, shape index: {}]   ;;  %s875_s5 = inlined_call_operand.vmem [shape: f32[16,64], index: 5, kind: input, shape index: {}]   ;;  %s876_s6 = inlined_call_operand.vmem [shape: f32[16,1], index: 6, kind: input, shape index: {}]   ;;  %s877_s7 = inlined_call_operand.hbm [shape: f32[16,64], index: 7, kind: output, shape index: {}]  }
   0x1   :  { %v30_v0 = vld [vmem:[%s870_s0 + $0x18] sm:$0xff]  ;;  %v29_v1 = vld [vmem:[%s870_s0 + $0x10] sm:$0xff]  ;;  %v31_v2 = vld [vmem:[%s871_s1] sm:$0xff]  ;;  %659 = vset.pattern.permute.xlu0 %v683_v3  ;;  %660 = vset.pattern.permute.xlu1 %v683_v3 }
   0x2   :  { %588 = vmatprep.subr.mxu0 %v30_v0  ;;  %v28_v4 = vld [vmem:[%s870_s0 + $0x8] sm:$0xff]  ;;  %596 = vmatprep.mubr.msk.f32.mxu0 %vm87_vm0, %v31_v2  ;;  %v27_v5 = vld [vmem:[%s870_s0] sm:$0xff]  ;;  %v46_v6 = vld [vmem:[%s872_s2 + $0x38] sm:$0xff] }
   0x3   :  { %589 = vmatpush3.msra.mxu0 %v30_v0  ;;  %v44_v7 = vld [vmem:[%s872_s2 + $0x28] sm:$0xff]  ;;  %84 = vperm.xlu0 %659, %v46_v6   ;;  %v45_v9 = vld [vmem:[%s872_s2 + $0x30] sm:$0xff]  ;;  %v43_v11 = vld [vmem:[%s872_s2 + $0x20] sm:$0xff] }
   0x4   :  { %590 = vmatprep.subr.mxu0 %v29_v1  ;;  %v32_v8 = vld [vmem:[%s871_s1 + $0x8] sm:$0xff]  ;;  %74 = vperm.xlu1 %660, %v44_v7   ;;  %v33_v10 = vld [vmem:[%s871_s1 + $0x10] sm:$0xff]  ;;  %v34_v12 = vld [vmem:[%s871_s1 + $0x18] sm:$0xff] }
   0x5   :  { %591 = vmatpush3.msra.mxu0 %v29_v1  ;;  %v42_v13 = vld [vmem:[%s872_s2 + $0x18] sm:$0xff] }
   0x6   :  { %592 = vmatprep.subr.mxu0 %v28_v4 }
   0x7   :  { %593 = vmatpush3.msra.mxu0 %v28_v4  ;;  %79 = vperm.xlu0 %659, %v45_v9  }
   0x8   :  { %594 = vmatprep.subr.mxu0 %v27_v5  ;;  %69 = vperm.xlu1 %660, %v43_v11  }
   0x9   :  { %595 = vmatpush3.msra.mxu0 %v27_v5 }
   0xa   :  { %597 = vmatmul.mubr.msk.f32.vlgmr.msra.gmra.mxu0 %vm87_vm0, %v32_v8 }
   0xb   :  { %599 = vmatprep.mubr.msk.f32.mxu0 %vm87_vm0, %v33_v10 }
   0xc   :  { %12 = vsyncpa [#allocation3], 0  ;;  %v35_v14 = vld [vmem:[%s871_s1 + $0x20] sm:$0xff]  ;;  %v41_v15 = vld [vmem:[%s872_s2 + $0x10] sm:$0xff]  ;;  %64 = vperm.xlu0 %659, %v42_v13   ;;  %vm281_vm1 = vcmask 523264   ;;  %s684_s25 = smov [#allocation2]  }
   0xd   :  { %v36_v16 = vld [vmem:[%s871_s1 + $0x28] sm:$0xff]  ;;  %59 = vperm.xlu1 %660, %v41_v15   ;;  %v37_v18 = vld [vmem:[%s871_s1 + $0x30] sm:$0xff]  ;;  %v39_v19 = vld [vmem:[%s872_s2] sm:$0xff]  ;;  %s521_s26 = sshll.u32 %s684_s25, 4  ;;  %s522_s26 = int_to_ptr.vmem [resolvable:$true] %s521_s26 }
   0xe   :  { %600 = vmatmul.mubr.msk.f32.gmra.mxu0 %vm87_vm0, %v34_v12  ;;  %v40_v17 = vld [vmem:[%s872_s2 + $0x8] sm:$0xff]  ;;  %v38_v20 = vld [vmem:[%s871_s1 + $0x38] sm:$0xff]  ;;  %v239_v22 = vld [vmem:[%s874_s4 + $0x30] sm:$0xff]  ;;  %s661_s27 = scalar_lea.vmem %s522_s26, 256  ;;  %p666_p1 = scmp.lt.s32.totalorder %s522_s26, %s522_s26 }
   0xf   :  { %602 = vmatprep.mubr.msk.f32.mxu0 %vm87_vm0, %v35_v14  ;;  %v240_v21 = vld [vmem:[%s874_s4 + $0x38] sm:$0xff]  ;;  %v238_v23 = vld [vmem:[%s874_s4 + $0x28] sm:$0xff]  ;;  %v237_v24 = vld [vmem:[%s874_s4 + $0x20] sm:$0xff]  ;;  %p662_p0 = scmp.ne.s32.totalorder %s522_s26, %s661_s27  ;;  %p667_p2 = scmp.lt.s32.totalorder %s661_s27, %s661_s27 }
  0x10   :  { %54 = vperm.xlu0 %659, %v40_v17   ;;  %v236_v25 = vld [vmem:[%s874_s4 + $0x18] sm:$0xff]  ;;  %v235_v26 = vld [vmem:[%s874_s4 + $0x10] sm:$0xff]  ;;  %v234_v27 = vld [vmem:[%s874_s4 + $0x8] sm:$0xff] }
  0x11   :  { %49 = vperm.xlu1 %660, %v39_v19   ;;  %v233_v28 = vld [vmem:[%s874_s4] sm:$0xff]  ;;  %v422_v30 = vld [vmem:[%s876_s6 + $0x8] sm:$0xff]  ;;  %v227_v1 = vld [vmem:[%s873_s3 + $0x10] sm:$0xff]  ;;  %p668_p3 = por %p667_p2, %p666_p1 }
  0x12   :  { %603 = vmatmul.mubr.msk.f32.gmra.mxu0 %vm87_vm0, %v36_v16  ;;  %v421_v29 = vld [vmem:[%s876_s6] sm:$0xff]  ;;  %v226_v0 = vld [vmem:[%s873_s3 + $0x8] sm:$0xff]  ;;  %v228_v2 = vld [vmem:[%s873_s3 + $0x18] sm:$0xff] }
  0x13   :  { %605 = vmatprep.mubr.msk.f32.mxu0 %vm87_vm0, %v37_v18  ;;  %v225_v31 = vld [vmem:[%s873_s3] sm:$0xff]  ;;  %v230_v4 = vld [vmem:[%s873_s3 + $0x28] sm:$0xff]  ;;  %v231_v5 = vld [vmem:[%s873_s3 + $0x30] sm:$0xff]  ;;  %p669_p4 = pnand %p668_p3, %p662_p0 }
  0x14   :  { %278 = vperm.xlu0 %659, %v240_v21   ;;  %624 = vmatprep.mubr.msk.f32.mxu1 %vm281_vm1, %v225_v31  ;;  %v229_v3 = vld [vmem:[%s873_s3 + $0x20] sm:$0xff]  ;;  %v232_v6 = vld [vmem:[%s873_s3 + $0x38] sm:$0xff] }
  0x15   :  { %273 = vperm.xlu1 %660, %v239_v22   ;;  %v419_v7 = vld [vmem:[%s875_s5] sm:$0xff] }
  0x16   :  { %606 = vmatmul.mubr.msk.f32.gmra.mxu0 %vm87_vm0, %v38_v20 }
  0x17   :  { %652 = vmatprep.mubr.msk.f32.mxu0 %vm281_vm1, %v419_v7 }
  0x18   :  { %268 = vperm.xlu0 %659, %v238_v23  }
  0x19   :  { %263 = vperm.xlu1 %660, %v237_v24  }
  0x1c   :  { %258 = vperm.xlu0 %659, %v236_v25  }
  0x1d   :  { %253 = vperm.xlu1 %660, %v235_v26  }
  0x20   :  { %248 = vperm.xlu0 %659, %v234_v27  }
  0x21   :  { %243 = vperm.xlu1 %660, %v233_v28  }
  0x24   :  { %425 = vperm.xlu0 %659, %v421_v29  }
  0x25   :  { %430 = vperm.xlu1 %660, %v422_v30  }
  0x7e   :  { %v85_v34 = vpop.permute.xlu0 %84 }
  0x7f   :  { %v75_v36 = vpop.permute.xlu1 %74 }
  0x82   :  { %v80_v39 = vpop.permute.xlu0 %79 }
  0x83   :  { %v70_v41 = vpop.permute.xlu1 %69 }
  0x87   :  { %v65_v48 = vpop.permute.xlu0 %64 }
  0x88   :  { %v60_v51 = vpop.permute.xlu1 %59 }
  0x8b   :  { %v55_v56 = vpop.permute.xlu0 %54 }
  0x8c   :  { %v50_v59 = vpop.permute.xlu1 %49 }
  0x8f   :  { %v279_v10 = vpop.permute.xlu0 %278 }
  0x90   :  { %v274_v12 = vpop.permute.xlu1 %273 }
  0x93   :  { %v269_v15 = vpop.permute.xlu0 %268 }
  0x94   :  { %v264_v17 = vpop.permute.xlu1 %263 }
  0x97   :  { %v259_v24 = vpop.permute.xlu0 %258 }
  0x98   :  { %v254_v27 = vpop.permute.xlu1 %253 }
  0xca   :  { %v598_v32 = vpop.f32.mrf.mxu0 }
  0xcb   :  { %v184_v57 = vadd.f32 %v598_v32, %v55_v56  ;;  %v249_v32 = vpop.permute.xlu0 %248 }
  0xcc   :  { %v178_v33 = vpop.f32.mrf.mxu0 }
  0xcd   :  { %v179_v60 = vadd.f32 %v178_v33, %v50_v59  ;;  %v218_v62 = vmax.f32 %v184_v57, 0.0 }
  0xce   :  { %v601_v35 = vpop.f32.mrf.mxu0 }
  0xcf   :  { %v194_v52 = vadd.f32 %v601_v35, %v65_v48  ;;  %v217_v63 = vmax.f32 %v179_v60, 0.0  ;;  %v244_v35 = vpop.permute.xlu1 %243 }
  0xd0   :  { %v188_v37 = vpop.f32.mrf.mxu0 }
  0xd1   :  { %v189_v54 = vadd.f32 %v188_v37, %v60_v51  ;;  %v220_v58 = vmax.f32 %v194_v52, 0.0 }
  0xd2   :  { %v604_v38 = vpop.f32.mrf.mxu0 }
  0xd3   :  { %v204_v45 = vadd.f32 %v604_v38, %v75_v36  ;;  %v219_v61 = vmax.f32 %v189_v54, 0.0 }
  0xd4   :  { %v198_v40 = vpop.f32.mrf.mxu0 }
  0xd5   :  { %v199_v49 = vadd.f32 %v198_v40, %v70_v41  ;;  %v222_v53 = vmax.f32 %v204_v45, 0.0  ;;  %v420_v40 = vld [vmem:[%s875_s5 + $0x8] sm:$0xff]  ;;  %v431_v41 = vpop.permute.xlu1 %430 }
  0xd6   :  { %v607_v42 = vpop.f32.mrf.mxu0 }
  0xd7   :  { %v214_v43 = vadd.f32 %v607_v42, %v85_v34  ;;  %v221_v55 = vmax.f32 %v199_v49, 0.0 }
  0xd8   :  { %v208_v44 = vpop.f32.mrf.mxu0 }
  0xd9   :  { %v224_v46 = vmax.f32 %v214_v43, 0.0  ;;  %v209_v47 = vadd.f32 %v208_v44, %v80_v39  ;;  %v426_v44 = vpop.permute.xlu0 %425 }
  0xdb   :  { %v223_v50 = vmax.f32 %v209_v47, 0.0  ;;  %608 = vmatprep.subr.mxu1 %v224_v46 }
  0xdc   :  { %609 = vmatpush3.msra.mxu1 %v224_v46 }
  0xdd   :  { %610 = vmatprep.subr.mxu1 %v223_v50 }
  0xde   :  { %611 = vmatpush3.msra.mxu1 %v223_v50 }
  0xdf   :  { %612 = vmatprep.subr.mxu1 %v222_v53 }
  0xe0   :  { %613 = vmatpush3.msra.mxu1 %v222_v53 }
  0xe1   :  { %614 = vmatprep.subr.mxu1 %v221_v55 }
  0xe2   :  { %615 = vmatpush3.msra.mxu1 %v221_v55 }
  0xe3   :  { %616 = vmatprep.subr.mxu1 %v220_v58 }
  0xe4   :  { %617 = vmatpush3.msra.mxu1 %v220_v58 }
  0xe5   :  { %618 = vmatprep.subr.mxu1 %v219_v61 }
  0xe6   :  { %619 = vmatpush3.msra.mxu1 %v219_v61 }
  0xe7   :  { %620 = vmatprep.subr.mxu1 %v218_v62 }
  0xe8   :  { %621 = vmatpush3.msra.mxu1 %v218_v62 }
  0xe9   :  { %622 = vmatprep.subr.mxu1 %v217_v63 }
  0xea   :  { %623 = vmatpush3.msra.mxu1 %v217_v63 }
  0xeb   :  { %625 = vmatmul.mubr.msk.f32.vlgmr.msra.gmra.mxu1 %vm281_vm1, %v226_v0 }
  0xec   :  { %627 = vmatprep.mubr.msk.f32.mxu1 %vm281_vm1, %v227_v1 }
  0xef   :  { %628 = vmatmul.mubr.msk.f32.gmra.mxu1 %vm281_vm1, %v228_v2 }
  0xf0   :  { %630 = vmatprep.mubr.msk.f32.mxu1 %vm281_vm1, %v229_v3 }
  0xf3   :  { %631 = vmatmul.mubr.msk.f32.gmra.mxu1 %vm281_vm1, %v230_v4 }
  0xf4   :  { %633 = vmatprep.mubr.msk.f32.mxu1 %vm281_vm1, %v231_v5 }
  0xf7   :  { %634 = vmatmul.mubr.msk.f32.gmra.mxu1 %vm281_vm1, %v232_v6 }
 0x1ab   :  { %v626_v8 = vpop.f32.mrf.mxu1 }
 0x1ac   :  { %v378_v33 = vadd.f32 %v626_v8, %v249_v32 }
 0x1ad   :  { %v372_v9 = vpop.f32.mrf.mxu1 }
 0x1ae   :  { %v373_v36 = vadd.f32 %v372_v9, %v244_v35  ;;  %v412_v38 = vmax.f32 %v378_v33, 0.0 }
 0x1af   :  { %v629_v11 = vpop.f32.mrf.mxu1 }
 0x1b0   :  { %v388_v28 = vadd.f32 %v629_v11, %v259_v24  ;;  %v411_v39 = vmax.f32 %v373_v36, 0.0 }
 0x1b1   :  { %v382_v13 = vpop.f32.mrf.mxu1 }
 0x1b2   :  { %v383_v30 = vadd.f32 %v382_v13, %v254_v27  ;;  %v414_v34 = vmax.f32 %v388_v28, 0.0 }
 0x1b3   :  { %v632_v14 = vpop.f32.mrf.mxu1 }
 0x1b4   :  { %v398_v21 = vadd.f32 %v632_v14, %v269_v15  ;;  %v413_v37 = vmax.f32 %v383_v30, 0.0 }
 0x1b5   :  { %v392_v16 = vpop.f32.mrf.mxu1 }
 0x1b6   :  { %v393_v25 = vadd.f32 %v392_v16, %v264_v17  ;;  %v416_v29 = vmax.f32 %v398_v21, 0.0 }
 0x1b7   :  { %v635_v18 = vpop.f32.mrf.mxu1 }
 0x1b8   :  { %v408_v19 = vadd.f32 %v635_v18, %v279_v10  ;;  %v415_v31 = vmax.f32 %v393_v25, 0.0 }
 0x1b9   :  { %v402_v20 = vpop.f32.mrf.mxu1 }
 0x1ba   :  { %v418_v22 = vmax.f32 %v408_v19, 0.0  ;;  %v403_v23 = vadd.f32 %v402_v20, %v274_v12 }
 0x1bc   :  { %v417_v26 = vmax.f32 %v403_v23, 0.0  ;;  %636 = vmatprep.subr.mxu0 %v418_v22 }
 0x1bd   :  { %637 = vmatpush3.msra.mxu0 %v418_v22 }
 0x1be   :  { %638 = vmatprep.subr.mxu0 %v417_v26 }
 0x1bf   :  { %639 = vmatpush3.msra.mxu0 %v417_v26 }
 0x1c0   :  { %640 = vmatprep.subr.mxu0 %v416_v29 }
 0x1c1   :  { %641 = vmatpush3.msra.mxu0 %v416_v29 }
 0x1c2   :  { %642 = vmatprep.subr.mxu0 %v415_v31 }
 0x1c3   :  { %643 = vmatpush3.msra.mxu0 %v415_v31 }
 0x1c4   :  { %644 = vmatprep.subr.mxu0 %v414_v34 }
 0x1c5   :  { %645 = vmatpush3.msra.mxu0 %v414_v34 }
 0x1c6   :  { %646 = vmatprep.subr.mxu0 %v413_v37 }
 0x1c7   :  { %647 = vmatpush3.msra.mxu0 %v413_v37 }
 0x1c8   :  { %648 = vmatprep.subr.mxu0 %v412_v38 }
 0x1c9   :  { %649 = vmatpush3.msra.mxu0 %v412_v38 }
 0x1ca   :  { %650 = vmatprep.subr.mxu0 %v411_v39 }
 0x1cb   :  { %651 = vmatpush3.msra.mxu0 %v411_v39 }
 0x1cc   :  { %653 = vmatmul.mubr.msk.f32.vlgmr.msra.gmra.mxu0 %vm281_vm1, %v420_v40 }
 0x28c   :  { %v654_v42 = vpop.f32.mrf.mxu0 }
 0x28d   :  { %v511_v43 = vadd.f32 %v654_v42, %v431_v41 }
 0x28e   :  { %v505_v45 = vpop.f32.mrf.mxu0 }
 0x28f   :  { %515 = vst.msk [vmem:[#allocation2 + $0x8] sm:$0xff] %vm281_vm1, %v511_v43  ;;  %v506_v46 = vadd.f32 %v505_v45, %v426_v44 }
 0x291   :  { %514 = vst.msk [vmem:[#allocation2] sm:$0xff] %vm281_vm1, %v506_v46 }
 0x292   :  { %672 = shalt.err (!%p669_p4)
}
 0x293   :  { %s685_s5 = smov 128   ;;  %s686_s28 = smov 8  }
 0x294   :  { %527 = dma.vmem_to_hbm [thread:$0]  %s522_s26, 256, %s877_s7, [#allocation3], %s685_s5, %s685_s5, %s686_s28  }
 0x295   :  { %681 = dma.done.wait [#allocation3], 256  }
 0x296   :  { %682 = vsyncadd [#allocation3], 4294967040 }
 0x297   :  { %531 = vsyncpa [#allocation3], 1 }

</bundles_post_ra>
